<compile_context>
chip_gen: v6e
topology: v6e:2x2x1
jax: 0.10.0
libtpu: 0.0.40
codegen_flags: <defaults>
</compile_context>

<pallas_src>
import functools

import jax
import jax.numpy as jnp
from jax.experimental import pallas as pl
from jax.experimental.pallas import tpu as pltpu

_SQRT_HALF = 0.7071067811865476        # 1/sqrt(2)
_SQRT_2_OVER_PI = 0.7978845608028654   # sqrt(2/pi)


def _gelu(x, approximate):
    if approximate:
        # tanh-approx: transcendental moves to the EUP slot (useful if VALU-bound
        # on v6e/v7x once compute-bound).  Changes numerics vs nn.GELU() default,
        # so it is opt-in.
        return 0.5 * x * (1.0 + jnp.tanh(_SQRT_2_OVER_PI * (x + 0.044715 * x * x * x)))
    # nn.GELU() default = exact erf-based GELU (computed in f32).
    return 0.5 * x * (1.0 + jax.lax.erf(x * _SQRT_HALF))


# ---------------------------------------------------------------------------
# Kernels
# ---------------------------------------------------------------------------

def _mlp_kernel_fused(x_ref, w1_ref, b1_ref, w2_ref, b2_ref, o_ref, *, approximate):
    """Resident-weights path: whole hidden dim in one step, no accumulator."""
    h = jnp.dot(x_ref[...], w1_ref[...], preferred_element_type=jnp.float32)
    h = h + b1_ref[...]
    g = _gelu(h, approximate)
    y = jnp.dot(g.astype(w2_ref.dtype), w2_ref[...], preferred_element_type=jnp.float32)
    o_ref[...] = (y + b2_ref[...]).astype(o_ref.dtype)


def _mlp_kernel_slab(x_ref, w1_ref, b1_ref, w2_ref, b2_ref, o_ref, acc_ref, *, approximate):
    """Hidden-slab reduction path with f32 VMEM accumulator."""
    k = pl.program_id(1)

    h = jnp.dot(x_ref[...], w1_ref[...], preferred_element_type=jnp.float32)
    h = h + b1_ref[...]
    g = _gelu(h, approximate)
    part = jnp.dot(g.astype(w2_ref.dtype), w2_ref[...], preferred_element_type=jnp.float32)

    # No zero-init pass: first step writes, later steps accumulate.
    @pl.when(k == 0)
    def _():
        acc_ref[...] = part

    @pl.when(k != 0)
    def _():
        acc_ref[...] += part

    @pl.when(k == pl.num_programs(1) - 1)
    def _():
        o_ref[...] = (acc_ref[...] + b2_ref[...]).astype(o_ref.dtype)


# ---------------------------------------------------------------------------
# Tile selection / VMEM budgeting
# ---------------------------------------------------------------------------

def _round_up(x, m):
    return ((x + m - 1) // m) * m


def _vmem_capacity_bytes():
    try:
        cap = int(pltpu.get_tpu_info().vmem_capacity_bytes)
        if cap > 0:
            return cap
    except Exception:
        pass
    return 64 * 1024 * 1024  # conservative default (v7x per-TensorCore)


def _slab_candidates(H):
    # Lane-aligned divisors of H, largest first, excluding H itself.
    return sorted((d for d in range(128, H, 128) if H % d == 0), reverse=True)


def _vmem_use_bytes(tm, th, D, H, c_size, o_size):
    w = 2 * 2 * D * th * c_size           # w1 + w2 blocks, double-buffered
    x = 2 * tm * D * c_size               # x row tile, double-buffered
    o = 2 * tm * D * o_size               # out row tile, double-buffered
    b = 2 * (th + D) * 4                  # f32 biases
    acc = tm * D * 4 if th < H else 0     # f32 accumulator scratch (slab path only)
    tmp = 2 * tm * th * 4                 # f32 h / gelu(h) intermediates
    return w + x + o + b + acc + tmp


def _select_tiles(M, D, H, c_size, o_size, budget):
    row_align = 16 if c_size < 4 else 8   # bf16 packs 16 rows per sublane group
    m_cap = _round_up(M, row_align)

    def clamp(tm):
        return _round_up(min(tm, m_cap), row_align)

    def fits(tm, th):
        return _vmem_use_bytes(tm, th, D, H, c_size, o_size) <= budget

    # 1) Resident-weights path: single reduction step, weights DMA'd once.
    for tm in (512, 384, 256, 128):
        tm = clamp(tm)
        if fits(tm, H):
            return tm, H

    # 2) Slab path: weights re-streamed per row tile -> take the biggest row
    #    tile (flops per weight byte == tm) with the biggest slab that fits.
    slabs = _slab_candidates(H)
    for tm in (1024, 768, 512, 384, 256, 128):
        tm = clamp(tm)
        for th in slabs:
            if fits(tm, th):
                return tm, th

    # 3) Tiny-VMEM / huge-D fallback: shrink the row tile further.
    for tm in (64, 32, 16, 8):
        tm = clamp(tm)
        for th in (slabs or [H]):
            if fits(tm, th):
                return tm, th
    return clamp(8), (slabs[-1] if slabs else H)


# ---------------------------------------------------------------------------
# Forward
# ---------------------------------------------------------------------------

@functools.partial(
    jax.jit,
    static_argnames=("tm", "th", "compute_dtype", "approximate_gelu", "vmem_limit"))
def _mlp_forward_impl(x, w1, b1, w2, b2, *, tm, th, compute_dtype,
                      approximate_gelu, vmem_limit):
    B, T, D = x.shape
    H = w1.shape[1]
    M = B * T
    out_dtype = x.dtype
    c_size = jnp.dtype(compute_dtype).itemsize
    o_size = jnp.dtype(out_dtype).itemsize

    Mp = _round_up(M, tm)
    grid_m = Mp // tm

    x2d = x.reshape(M, D).astype(compute_dtype)
    if Mp != M:
        # Padded rows produce garbage (gelu(b1)@w2+b2) but are sliced off below.
        x2d = jnp.pad(x2d, ((0, Mp - M), (0, 0)))
    w1c = w1.astype(compute_dtype)
    w2c = w2.astype(compute_dtype)
    b1f = b1.reshape(1, H).astype(jnp.float32)
    b2f = b2.reshape(1, D).astype(jnp.float32)

    if th == H:
        # Resident-weights path: constant w1/w2 block index -> DMA'd once.
        kernel = functools.partial(_mlp_kernel_fused, approximate=approximate_gelu)
        grid = (grid_m,)
        in_specs = [
            pl.BlockSpec((tm, D), lambda i: (i, 0)),
            pl.BlockSpec((D, H), lambda i: (0, 0)),
            pl.BlockSpec((1, H), lambda i: (0, 0)),
            pl.BlockSpec((H, D), lambda i: (0, 0)),
            pl.BlockSpec((1, D), lambda i: (0, 0)),
        ]
        out_specs = pl.BlockSpec((tm, D), lambda i: (i, 0))
        scratch = []
        dim_sem = ("parallel",)
        weight_passes = 1
    else:
        # Slab path: hidden dim is the (arbitrary) reduction axis.
        # TODO(synk): add pipeline_mode=pl.Buffered(3) on w1/w2 if a trace shows
        # exposed DMA waits at slab boundaries (costs extra VMEM).
        kernel = functools.partial(_mlp_kernel_slab, approximate=approximate_gelu)
        grid = (grid_m, H // th)
        in_specs = [
            pl.BlockSpec((tm, D), lambda i, k: (i, 0)),   # x rows, resident over k
            pl.BlockSpec((D, th), lambda i, k: (0, k)),   # w1 hidden slab
            pl.BlockSpec((1, th), lambda i, k: (0, k)),   # b1 hidden slab
            pl.BlockSpec((th, D), lambda i, k: (k, 0)),   # w2 hidden slab
            pl.BlockSpec((1, D), lambda i, k: (0, 0)),    # b2
        ]
        out_specs = pl.BlockSpec((tm, D), lambda i, k: (i, 0))
        scratch = [pltpu.VMEM((tm, D), jnp.float32)]
        dim_sem = ("parallel", "arbitrary")
        weight_passes = grid_m                            # weights re-streamed per row tile

    cost = pl.CostEstimate(
        flops=4 * Mp * D * H,                  # 2*M*D*H (fc1) + 2*M*H*D (fc2)
        transcendentals=Mp * H,                # one erf/tanh per hidden element
        bytes_accessed=(Mp * D * c_size                      # x
                        + weight_passes * 2 * D * H * c_size  # w1 + w2 (actual passes)
                        + (H + D) * 4                        # biases (f32)
                        + Mp * D * o_size),                  # out
    )

    out2d = pl.pallas_call(
        kernel,
        out_shape=jax.ShapeDtypeStruct((Mp, D), out_dtype),
        grid_spec=pltpu.PrefetchScalarGridSpec(
            num_scalar_prefetch=0,
            grid=grid,
            in_specs=in_specs,
            out_specs=out_specs,
            scratch_shapes=scratch,
        ),
        compiler_params=pltpu.CompilerParams(
            dimension_semantics=dim_sem,
            vmem_limit_bytes=vmem_limit,
        ),
        cost_estimate=cost,
    )(x2d, w1c, b1f, w2c, b2f)

    if Mp != M:
        out2d = out2d[:M]
    return out2d.reshape(B, T, D)


def mlp_forward(x, w1, b1, w2, b2, *, tm=None, th=None,
                compute_dtype=jnp.bfloat16, approximate_gelu=False):
    """x: [B, T, D] -> [B, T, D]. w1: [D, H], w2: [H, D] (pre-transposed).

    tm/th override the auto tile selection (th must be a lane-aligned divisor
    of H, else it falls back to H).  bf16 compute (default) casts gelu(h) to
    bf16 before fc2; use compute_dtype=jnp.float32 for bit-tight comparisons.
    """
    B, T, D = x.shape
    H = w1.shape[1]
    M = B * T
    c_size = jnp.dtype(compute_dtype).itemsize
    o_size = jnp.dtype(x.dtype).itemsize

    cap = _vmem_capacity_bytes()
    budget = cap // 2                 # tile-selection budget (leave pipelining headroom)
    vmem_limit = (cap * 3) // 4       # scoped VMEM limit handed to Mosaic

    auto_tm, auto_th = _select_tiles(M, D, H, c_size, o_size, budget)
    row_align = 16 if c_size < 4 else 8

    if tm is None:
        tm_eff = auto_tm
    else:
        tm_eff = _round_up(min(tm, _round_up(M, row_align)), row_align)
    if th is None:
        th_eff = auto_th
    else:
        th_eff = th if (0 < th < H and H % th == 0 and th % 128 == 0) else H

    return _mlp_forward_impl(x, w1, b1, w2, b2, tm=tm_eff, th=th_eff,
                             compute_dtype=compute_dtype,
                             approximate_gelu=approximate_gelu,
                             vmem_limit=int(vmem_limit))


# ---------------------------------------------------------------------------
# Reference + tests
# ---------------------------------------------------------------------------

def mlp_reference(x, w1, b1, w2, b2):
    hp = jax.lax.Precision.HIGHEST
    h = jnp.einsum("btd,dh->bth", x, w1, precision=hp) + b1
    g = 0.5 * h * (1.0 + jax.lax.erf(h * _SQRT_HALF))
    return jnp.einsum("bth,hd->btd", g, w2, precision=hp) + b2


def _make_params(key, D, H):
    kw1, kb1, kw2, kb2 = jax.random.split(key, 4)
    # "torch-like" init, stored pre-transposed as (in_dim, out_dim).
    w1 = jax.random.uniform(kw1, (D, H), jnp.float32, -1.0, 1.0) / jnp.sqrt(D)
    b1 = jax.random.uniform(kb1, (H,), jnp.float32, -1.0, 1.0) / jnp.sqrt(D)
    w2 = jax.random.uniform(kw2, (H, D), jnp.float32, -1.0, 1.0) / jnp.sqrt(H)
    b2 = jax.random.uniform(kb2, (D,), jnp.float32, -1.0, 1.0) / jnp.sqrt(H)
    return w1, b1, w2, b2


if __name__ == "__main__":
    key = jax.random.PRNGKey(0)

    # ---- Test 1: toy config (n_embed=32, hidden=128), f32 compute, tight tolerance.
    #      Exercises the resident-weights (fused, no-accumulator) path.
    B, T, D = 2, 8, 32
    H = 4 * D
    k1, k2, key = jax.random.split(key, 3)
    x = jax.random.normal(k1, (B, T, D), dtype=jnp.float32)
    w1, b1, w2, b2 = _make_params(k2, D, H)

    out = mlp_forward(x, w1, b1, w2, b2, compute_dtype=jnp.float32)
    jax.block_until_ready(out)
    ref = mlp_reference(x, w1, b1, w2, b2)
    assert out.shape == (B, T, D)
    assert jnp.allclose(out, ref, atol=1e-5, rtol=1e-5), "f32 mismatch vs reference"

    # ---- Test 2: forced slab path (tm=64, th=128 over H=512 -> 4 accumulation
    #      steps) plus M padding (200 -> 256), f32 compute.
    B2, T2, D2 = 2, 100, 128
    H2 = 4 * D2
    k3, k4, key = jax.random.split(key, 3)
    x2 = jax.random.normal(k3, (B2, T2, D2), dtype=jnp.float32)
    p2 = _make_params(k4, D2, H2)
    out2 = mlp_forward(x2, *p2, tm=64, th=128, compute_dtype=jnp.float32)
    jax.block_until_ready(out2)
    ref2 = mlp_reference(x2, *p2)
    assert out2.shape == (B2, T2, D2)
    assert jnp.allclose(out2, ref2, atol=2e-4, rtol=2e-4), "tiled f32 mismatch"

    # ---- Test 3: default auto-tuned fast path (bf16 MXU inputs, f32 accumulation).
    out3 = mlp_forward(x2, *p2)
    jax.block_until_ready(out3)
    assert jnp.allclose(out3, ref2, atol=5e-2, rtol=5e-2), "bf16 mismatch"

    print("KERNEL_OK")
</pallas_src>

<mosaic_0001>
module attributes {stable_mosaic.version = 11 : i64} {
  func.func @_mlp_kernel_fused(%arg0: i32, %arg1: memref<16x32xf32, #tpu.memory_space<vmem>>, %arg2: memref<32x128xf32, #tpu.memory_space<vmem>>, %arg3: memref<1x128xf32, #tpu.memory_space<vmem>>, %arg4: memref<128x32xf32, #tpu.memory_space<vmem>>, %arg5: memref<1x32xf32, #tpu.memory_space<vmem>>, %arg6: memref<16x32xf32, #tpu.memory_space<vmem>>) attributes {dimension_semantics = [#tpu.dimension_semantics<parallel>], iteration_bounds = array<i64: 1>, scalar_prefetch = 0 : i64, scratch_operands = 0 : i64, tpu.core_type = #tpu.core_type<tc>, window_params = [{transform_indices = @transform_0, window_bounds = array<i64: 16, 32>}, {pipeline_mode = #tpu.pipeline_mode<synchronous>, transform_indices = @transform_1, window_bounds = array<i64: 32, 128>}, {pipeline_mode = #tpu.pipeline_mode<synchronous>, transform_indices = @transform_2, window_bounds = array<i64: 1, 128>}, {pipeline_mode = #tpu.pipeline_mode<synchronous>, transform_indices = @transform_3, window_bounds = array<i64: 128, 32>}, {pipeline_mode = #tpu.pipeline_mode<synchronous>, transform_indices = @transform_4, window_bounds = array<i64: 1, 32>}, {transform_indices = @transform_5, window_bounds = array<i64: 16, 32>}]} {
    %c0 = arith.constant 0 : index
    %c0_0 = arith.constant 0 : index
    %0 = vector.load %arg1[%c0, %c0_0] : memref<16x32xf32, #tpu.memory_space<vmem>>, vector<16x32xf32>
    %c0_1 = arith.constant 0 : index
    %c0_2 = arith.constant 0 : index
    %1 = vector.load %arg2[%c0_1, %c0_2] : memref<32x128xf32, #tpu.memory_space<vmem>>, vector<32x128xf32>
    %cst = arith.constant dense<0.000000e+00> : vector<16x128xf32>
    %2 = tpu.matmul %0, %1, %cst {dimension_numbers = #tpu.dot_dimension_numbers<[1], [0], [0], [1], [0, 0, 1, 1], [], []>} : vector<16x32xf32>, vector<32x128xf32>, vector<16x128xf32> -> vector<16x128xf32>
    %c0_3 = arith.constant 0 : index
    %c0_4 = arith.constant 0 : index
    %3 = vector.load %arg3[%c0_3, %c0_4] : memref<1x128xf32, #tpu.memory_space<vmem>>, vector<1x128xf32>
    %4 = vector.broadcast %3 : vector<1x128xf32> to vector<16x128xf32>
    %5 = arith.addf %2, %4 : vector<16x128xf32>
    %cst_5 = arith.constant 5.000000e-01 : f32
    %6 = vector.broadcast %cst_5 : f32 to vector<16x128xf32>
    %7 = arith.mulf %6, %5 : vector<16x128xf32>
    %cst_6 = arith.constant 0.707106769 : f32
    %8 = vector.broadcast %cst_6 : f32 to vector<16x128xf32>
    %9 = arith.mulf %5, %8 : vector<16x128xf32>
    %10 = math.erf %9 : vector<16x128xf32>
    %cst_7 = arith.constant 1.000000e+00 : f32
    %11 = vector.broadcast %cst_7 : f32 to vector<16x128xf32>
    %12 = arith.addf %11, %10 : vector<16x128xf32>
    %13 = arith.mulf %7, %12 : vector<16x128xf32>
    %c0_8 = arith.constant 0 : index
    %c0_9 = arith.constant 0 : index
    %14 = vector.load %arg4[%c0_8, %c0_9] : memref<128x32xf32, #tpu.memory_space<vmem>>, vector<128x32xf32>
    %cst_10 = arith.constant dense<0.000000e+00> : vector<16x32xf32>
    %15 = tpu.matmul %13, %14, %cst_10 {dimension_numbers = #tpu.dot_dimension_numbers<[1], [0], [0], [1], [0, 0, 1, 1], [], []>} : vector<16x128xf32>, vector<128x32xf32>, vector<16x32xf32> -> vector<16x32xf32>
    %c0_11 = arith.constant 0 : index
    %c0_12 = arith.constant 0 : index
    %16 = vector.load %arg5[%c0_11, %c0_12] : memref<1x32xf32, #tpu.memory_space<vmem>>, vector<1x32xf32>
    %17 = vector.broadcast %16 : vector<1x32xf32> to vector<16x32xf32>
    %18 = arith.addf %15, %17 : vector<16x32xf32>
    %c0_13 = arith.constant 0 : index
    %c0_14 = arith.constant 0 : index
    %19 = vector.load %arg6[%c0_13, %c0_14] : memref<16x32xf32, #tpu.memory_space<vmem>>, vector<16x32xf32>
    tpu.vector_store %arg6[%c0_13, %c0_14], %18 {strides = array<i32>} : memref<16x32xf32, #tpu.memory_space<vmem>>, vector<16x32xf32>,
    return
  }
  func.func @transform_0(%arg0: i32) -> (i32, i32) {
    %c0_i32 = arith.constant 0 : i32
    %c0_i32_0 = arith.constant 0 : i32
    return %arg0, %c0_i32 : i32, i32
  }
  func.func @transform_1(%arg0: i32) -> (i32, i32) {
    %c0_i32 = arith.constant 0 : i32
    %c0_i32_0 = arith.constant 0 : i32
    %c0_i32_1 = arith.constant 0 : i32
    return %c0_i32, %c0_i32_0 : i32, i32
  }
  func.func @transform_2(%arg0: i32) -> (i32, i32) {
    %c0_i32 = arith.constant 0 : i32
    %c0_i32_0 = arith.constant 0 : i32
    %c0_i32_1 = arith.constant 0 : i32
    return %c0_i32, %c0_i32_0 : i32, i32
  }
  func.func @transform_3(%arg0: i32) -> (i32, i32) {
    %c0_i32 = arith.constant 0 : i32
    %c0_i32_0 = arith.constant 0 : i32
    %c0_i32_1 = arith.constant 0 : i32
    return %c0_i32, %c0_i32_0 : i32, i32
  }
  func.func @transform_4(%arg0: i32) -> (i32, i32) {
    %c0_i32 = arith.constant 0 : i32
    %c0_i32_0 = arith.constant 0 : i32
    %c0_i32_1 = arith.constant 0 : i32
    return %c0_i32, %c0_i32_0 : i32, i32
  }
  func.func @transform_5(%arg0: i32) -> (i32, i32) {
    %c0_i32 = arith.constant 0 : i32
    %c0_i32_0 = arith.constant 0 : i32
    return %arg0, %c0_i32 : i32, i32
  }
}

</mosaic_0001>

<bundles_post_ra>
// kernel: _mlp_forward_impl.1
= control target key start
LH: loop header
LB: loop body
LE: loop exit
PB: predicated region body
PF: predicated region fallthrough
CT: control target
= control target key end

     0   :  { %vm34_vm0 = vcmask 261120   ;;  %s457_s0 = inlined_call_operand.vmem [shape: f32[16,32], index: 0, kind: input, shape index: {}]   ;;  %s458_s1 = inlined_call_operand.vmem [shape: f32[32,128], index: 1, kind: input, shape index: {}]   ;;  %s459_s2 = inlined_call_operand.vmem [shape: f32[1,128], index: 2, kind: input, shape index: {}]   ;;  %s460_s3 = inlined_call_operand.vmem [shape: f32[128,32], index: 3, kind: input, shape index: {}]   ;;  %s461_s4 = inlined_call_operand.vmem [shape: f32[1,32], index: 4, kind: input, shape index: {}]   ;;  %s462_s5 = inlined_call_operand.hbm [shape: f32[16,32], index: 5, kind: output, shape index: {}]  }
   0x1   :  { %v26_v0 = vld [vmem:[%s458_s1 + $0x18] sm:$0xff]  ;;  %v25_v1 = vld [vmem:[%s458_s1 + $0x10] sm:$0xff]  ;;  %v21_v2 = vld [vmem:[%s457_s0] sm:$0xff] }
   0x2   :  { %270 = vmatprep.subr.mxu0 %v26_v0  ;;  %v24_v3 = vld [vmem:[%s458_s1 + $0x8] sm:$0xff]  ;;  %278 = vmatprep.mubr.msk.f32.mxu0 %vm34_vm0, %v21_v2  ;;  %v141_v4 = vld [vmem:[%s460_s3 + $0x78] sm:$0xff]  ;;  %v140_v5 = vld [vmem:[%s460_s3 + $0x70] sm:$0xff] }
   0x3   :  { %271 = vmatpush3.msra.mxu0 %v26_v0  ;;  %281 = vmatprep.subr.mxu1 %v141_v4 }
   0x4   :  { %272 = vmatprep.subr.mxu0 %v25_v1 }
   0x5   :  { %10 = vsyncpa [#allocation3], 0  ;;  %273 = vmatpush3.msra.mxu0 %v25_v1  ;;  %v23_v6 = vld [vmem:[%s458_s1] sm:$0xff]  ;;  %282 = vmatpush3.msra.mxu1 %v141_v4  ;;  %v139_v7 = vld [vmem:[%s460_s3 + $0x68] sm:$0xff]  ;;  %s345_s11 = smov [#allocation2]  }
   0x6   :  { %274 = vmatprep.subr.mxu0 %v24_v3  ;;  %283 = vmatprep.subr.mxu1 %v140_v5  ;;  %v22_v8 = vld [vmem:[%s457_s0 + $0x8] sm:$0xff]  ;;  %v138_v9 = vld [vmem:[%s460_s3 + $0x60] sm:$0xff]  ;;  %v137_v10 = vld [vmem:[%s460_s3 + $0x58] sm:$0xff]  ;;  %s231_s12 = sshll.u32 %s345_s11, 4  ;;  %s232_s12 = int_to_ptr.vmem [resolvable:$true] %s231_s12 }
   0x7   :  { %275 = vmatpush3.msra.mxu0 %v24_v3  ;;  %284 = vmatpush3.msra.mxu1 %v140_v5  ;;  %v136_v11 = vld [vmem:[%s460_s3 + $0x50] sm:$0xff]  ;;  %v135_v12 = vld [vmem:[%s460_s3 + $0x48] sm:$0xff]  ;;  %v134_v13 = vld [vmem:[%s460_s3 + $0x40] sm:$0xff]  ;;  %s323_s13 = scalar_lea.vmem %s232_s12, 256  ;;  %p328_p1 = scmp.lt.s32.totalorder %s232_s12, %s232_s12 }
   0x8   :  { %276 = vmatprep.subr.mxu0 %v23_v6  ;;  %285 = vmatprep.subr.mxu1 %v139_v7  ;;  %v133_v14 = vld [vmem:[%s460_s3 + $0x38] sm:$0xff]  ;;  %v132_v15 = vld [vmem:[%s460_s3 + $0x30] sm:$0xff]  ;;  %v131_v16 = vld [vmem:[%s460_s3 + $0x28] sm:$0xff]  ;;  %p324_p0 = scmp.ne.s32.totalorder %s232_s12, %s323_s13  ;;  %p329_p2 = scmp.lt.s32.totalorder %s323_s13, %s323_s13 }
   0x9   :  { %277 = vmatpush3.msra.mxu0 %v23_v6  ;;  %286 = vmatpush3.msra.mxu1 %v139_v7  ;;  %v130_v17 = vld [vmem:[%s460_s3 + $0x20] sm:$0xff]  ;;  %v129_v18 = vld [vmem:[%s460_s3 + $0x18] sm:$0xff]  ;;  %v128_v19 = vld [vmem:[%s460_s3 + $0x10] sm:$0xff] }
   0xa   :  { %279 = vmatmul.mubr.msk.f32.vlgmr.msra.gmra.mxu0 %vm34_vm0, %v22_v8  ;;  %287 = vmatprep.subr.mxu1 %v138_v9  ;;  %v127_v20 = vld [vmem:[%s460_s3 + $0x8] sm:$0xff]  ;;  %v126_v21 = vld [vmem:[%s460_s3] sm:$0xff]  ;;  %p330_p3 = por %p329_p2, %p328_p1 }
   0xb   :  { %288 = vmatpush3.msra.mxu1 %v138_v9  ;;  %v242_v22 = vld [vmem:[%s459_s2] ss:$0 sm:$0xff] }
   0xc   :  { %289 = vmatprep.subr.mxu1 %v137_v10  ;;  %v245_v37 = vld [vmem:[%s461_s4] ss:$0 sm:$0xff]  ;;  %p331_p4 = pnand %p330_p3, %p324_p0 }
   0xd   :  { %290 = vmatpush3.msra.mxu1 %v137_v10 }
   0xe   :  { %291 = vmatprep.subr.mxu1 %v136_v11 }
   0xf   :  { %292 = vmatpush3.msra.mxu1 %v136_v11 }
  0x10   :  { %293 = vmatprep.subr.mxu1 %v135_v12 }
  0x11   :  { %294 = vmatpush3.msra.mxu1 %v135_v12 }
  0x12   :  { %295 = vmatprep.subr.mxu1 %v134_v13 }
  0x13   :  { %296 = vmatpush3.msra.mxu1 %v134_v13 }
  0x14   :  { %297 = vmatprep.subr.mxu1 %v133_v14 }
  0x15   :  { %298 = vmatpush3.msra.mxu1 %v133_v14 }
  0x16   :  { %299 = vmatprep.subr.mxu1 %v132_v15 }
  0x17   :  { %300 = vmatpush3.msra.mxu1 %v132_v15 }
  0x18   :  { %301 = vmatprep.subr.mxu1 %v131_v16 }
  0x19   :  { %302 = vmatpush3.msra.mxu1 %v131_v16 }
  0x1a   :  { %303 = vmatprep.subr.mxu1 %v130_v17 }
  0x1b   :  { %304 = vmatpush3.msra.mxu1 %v130_v17 }
  0x1c   :  { %305 = vmatprep.subr.mxu1 %v129_v18 }
  0x1d   :  { %306 = vmatpush3.msra.mxu1 %v129_v18 }
  0x1e   :  { %307 = vmatprep.subr.mxu1 %v128_v19 }
  0x1f   :  { %308 = vmatpush3.msra.mxu1 %v128_v19 }
  0x20   :  { %309 = vmatprep.subr.mxu1 %v127_v20 }
  0x21   :  { %310 = vmatpush3.msra.mxu1 %v127_v20 }
  0x22   :  { %311 = vmatprep.subr.mxu1 %v126_v21 }
  0x23   :  { %312 = vmatpush3.msra.mxu1 %v126_v21 }
  0xca   :  { %v280_v23 = vpop.f32.mrf.mxu0 }
  0xcb   :  { %v113_v24 = vadd.f32 %v280_v23, %v242_v22 }
  0xcc   :  { %v107_v25 = vpop.f32.mrf.mxu0 }
  0xcd   :  { %v119_v26 = vmul.f32 0.70710677, %v113_v24  ;;  %v108_v27 = vadd.f32 %v242_v22, %v107_v25  ;;  %v117_v34 = vmul.f32 0.5, %v113_v24 }
  0xcf   :  { %319 = verf.f32 %v119_v26  ;;  %v118_v28 = vmul.f32 0.70710677, %v108_v27  ;;  %v116_v32 = vmul.f32 0.5, %v108_v27 }
  0xd1   :  { %321 = verf.f32 %v118_v28 }
  0xdc   :  { %v320_v29 = vpop.eup %319 }
  0xdd   :  { %v123_v31 = vadd.f32 1.0, %v320_v29 }
  0xde   :  { %v322_v30 = vpop.eup %321 }
  0xdf   :  { %v122_v33 = vadd.f32 1.0, %v322_v30  ;;  %v125_v36 = vmul.f32 %v123_v31, %v117_v34 }
  0xe1   :  { %v124_v35 = vmul.f32 %v122_v33, %v116_v32 }
  0xe3   :  { %313 = vmatprep.mubr.f32.mxu1 %v124_v35 }
  0xe4   :  { %314 = vmatmul.mubr.f32.vlgmr.msra.gmra.mxu1 %v125_v36 }
 0x1a4   :  { %v315_v38 = vpop.f32.mrf.mxu1 }
 0x1a5   :  { %v221_v39 = vadd.f32 %v315_v38, %v245_v37 }
 0x1a6   :  { %v215_v40 = vpop.f32.mrf.mxu1 }
 0x1a7   :  { %225 = vst.msk [vmem:[#allocation2 + $0x8] sm:$0xff] %vm34_vm0, %v221_v39  ;;  %v216_v41 = vadd.f32 %v245_v37, %v215_v40 }
 0x1a9   :  { %224 = vst.msk [vmem:[#allocation2] sm:$0xff] %vm34_vm0, %v216_v41 }
 0x1aa   :  { %334 = shalt.err (!%p331_p4)
}
 0x1ab   :  { %s346_s0 = smov 128   ;;  %s347_s4 = smov 8  }
 0x1ac   :  { %237 = dma.vmem_to_hbm [thread:$0]  %s232_s12, 256, %s462_s5, [#allocation3], %s346_s0, %s346_s0, %s347_s4  }
 0x1ad   :  { %343 = dma.done.wait [#allocation3], 256  }
 0x1ae   :  { %344 = vsyncadd [#allocation3], 4294967040 }
 0x1af   :  { %241 = vsyncpa [#allocation3], 1 }

</bundles_post_ra>
